<compile_context>
chip_gen: v7x
topology: tpu7x:2x2x1
jax: 0.10.0
libtpu: 0.0.40
codegen_flags: <defaults>
</compile_context>

<pallas_src>
import jax
import jax.numpy as jnp
from jax.experimental import pallas as pl
from jax.experimental.pallas import tpu as pltpu


def _round_up(n, m):
    return ((n + m - 1) // m) * m


def _act_dtype():
    """bf16 tanh on chips with a bf16 EUP (v6e / v7x); f32 elsewhere (v5e...)."""
    try:
        kind = jax.devices()[0].device_kind.lower()
    except Exception:
        return jnp.float32
    return jnp.bfloat16 if ("v6" in kind or "v7" in kind) else jnp.float32


def _choose_tile_b(B, requested):
    """Batch-tile size: big tiles for long DMA bursts, multiple of 8 (sublane),
    and a best-effort even tile count so v7x's two TensorCores split evenly."""
    requested = max(256, (requested // 256) * 256)
    if B <= 256:
        return _round_up(B, 8)                      # single small tile
    tb = min(requested, _round_up(pl.cdiv(B, 2), 256))
    n = pl.cdiv(B, tb)
    if n % 2 == 1 and n > 1:                        # odd grid -> try one more tile
        tb_even = _round_up(pl.cdiv(B, n + 1), 8)
        if pl.cdiv(B, tb_even) % 2 == 0:
            tb = tb_even
    return tb


def _make_kernel(act_dtype):
    def mlp_classifier_kernel(x_ref,
                              w1_ref, b1_ref,
                              w2_ref, b2_ref,
                              w3_ref, b3_ref,
                              w4t_ref, b4_ref,
                              o_ref):
        # x_ref: [TILE_B, 768] batch tile in its HBM dtype (usually f32),
        # streamed / double-buffered.  Cast to bf16 here (VPU, hidden under DMA)
        # so the MXU sees its native dtype without an extra HBM pass upstream.
        x = x_ref[...].astype(jnp.bfloat16)

        # Layer 1: Linear(768 -> 256) + Tanh
        h = jnp.dot(x, w1_ref[...], preferred_element_type=jnp.float32)
        h = jnp.tanh((h + b1_ref[...]).astype(act_dtype))
        # TODO(synk): nn.Dropout(0.2) in train mode would need pltpu.prng_seed +
        # pltpu.prng_random_bits with 1/(1-p) rescaling; eval-mode identity here.

        # Layer 2: Linear(256 -> 128) + Tanh
        h = jnp.dot(h.astype(jnp.bfloat16), w2_ref[...],
                    preferred_element_type=jnp.float32)
        h = jnp.tanh((h + b2_ref[...]).astype(act_dtype))

        # Layer 3: Linear(128 -> 64) + Tanh
        h = jnp.dot(h.astype(jnp.bfloat16), w3_ref[...],
                    preferred_element_type=jnp.float32)
        h = jnp.tanh((h + b3_ref[...]).astype(act_dtype))

        # Layer 4: Linear(64 -> 1) + Sigmoid on VPU (mul) + XLU (cross-lane sum)
        # instead of an N=1 MXU matmul that would waste 127/255 of the array.
        logit = jnp.sum(h.astype(jnp.float32) * w4t_ref[...],
                        axis=-1, keepdims=True) + b4_ref[...]
        o_ref[...] = jax.nn.sigmoid(logit).astype(o_ref.dtype)

    return mlp_classifier_kernel


def mlp_classifier(x, params, *, tile_b=1024):
    """x: [B, input_shape]. params: w{i}: [in, out] (= PyTorch weight.T), b{i}: [1, out]."""
    B, F = x.shape
    act_dtype = _act_dtype()

    # Weights are tiny (~0.5 MB total in bf16) and stay VMEM-resident via
    # constant index_maps; x is streamed in its HBM dtype and cast in-kernel.
    w1 = params["w1"].astype(jnp.bfloat16)
    w2 = params["w2"].astype(jnp.bfloat16)
    w3 = params["w3"].astype(jnp.bfloat16)
    w4t = params["w4"].T.astype(jnp.float32)            # [1, 64], used on the VPU
    b1 = params["b1"].astype(jnp.float32)
    b2 = params["b2"].astype(jnp.float32)
    b3 = params["b3"].astype(jnp.float32)
    b4 = params["b4"].astype(jnp.float32)                # [1, 1]

    tb = _choose_tile_b(B, tile_b)
    grid = (pl.cdiv(B, tb),)                             # ragged tail handled by
                                                         # masked partial store

    def resident(shape):
        # Constant index_map -> fetched once, stays resident in VMEM for all tiles.
        return pl.BlockSpec(shape, lambda i: (0, 0))

    weight_bytes = sum(int(a.size) * a.dtype.itemsize
                       for a in (w1, b1, w2, b2, w3, b3, w4t, b4))
    cost = pl.CostEstimate(
        flops=2 * B * (F * 256 + 256 * 128 + 128 * 64 + 64),
        transcendentals=B * (256 + 128 + 64 + 1),
        bytes_accessed=B * F * x.dtype.itemsize + B * 4 + weight_bytes,
    )

    out = pl.pallas_call(
        _make_kernel(act_dtype),
        out_shape=jax.ShapeDtypeStruct((B, 1), jnp.float32),
        grid_spec=pltpu.PrefetchScalarGridSpec(
            num_scalar_prefetch=0,
            grid=grid,
            in_specs=[
                # Streamed x tile, double-buffered by the pipeline.
                pl.BlockSpec((tb, F), lambda i: (i, 0)),
                resident(w1.shape), resident(b1.shape),
                resident(w2.shape), resident(b2.shape),
                resident(w3.shape), resident(b3.shape),
                resident(w4t.shape), resident(b4.shape),
            ],
            out_specs=pl.BlockSpec((tb, 1), lambda i: (i, 0)),
        ),
        compiler_params=pltpu.CompilerParams(
            # Batch tiles are independent -> shard across both TCs on v7x
            # (no-op on single-TC v5e/v6e).
            dimension_semantics=("parallel",),
            # tile_b=1024 f32 x tiles (double-buffered) exceed v5e's 16 MiB
            # scoped default; 32 MiB is safe on every generation.
            vmem_limit_bytes=32 * 1024 * 1024,
        ),
        cost_estimate=cost,
    )(x, w1, b1, w2, b2, w3, b3, w4t, b4)

    return out


def mlp_classifier_ref(x, params, act_dtype=jnp.float32):
    """Pure-JAX reference following the kernel's precision path."""
    h = jnp.dot(x.astype(jnp.bfloat16), params["w1"].astype(jnp.bfloat16),
                preferred_element_type=jnp.float32)
    h = jnp.tanh((h + params["b1"]).astype(act_dtype))
    h = jnp.dot(h.astype(jnp.bfloat16), params["w2"].astype(jnp.bfloat16),
                preferred_element_type=jnp.float32)
    h = jnp.tanh((h + params["b2"]).astype(act_dtype))
    h = jnp.dot(h.astype(jnp.bfloat16), params["w3"].astype(jnp.bfloat16),
                preferred_element_type=jnp.float32)
    h = jnp.tanh((h + params["b3"]).astype(act_dtype))
    logit = jnp.sum(h.astype(jnp.float32) * params["w4"].T,
                    axis=-1, keepdims=True) + params["b4"]
    return jax.nn.sigmoid(logit)


def init_params(key, input_shape=256 * 3):
    """Deterministic init mimicking PyTorch nn.Linear default U(-1/sqrt(fan_in), +1/sqrt(fan_in))."""
    dims = [input_shape, 256, 128, 64, 1]
    params = {}
    keys = jax.random.split(key, 2 * (len(dims) - 1))
    for i in range(len(dims) - 1):
        fan_in, fan_out = dims[i], dims[i + 1]
        bound = 1.0 / jnp.sqrt(fan_in)
        params[f"w{i + 1}"] = jax.random.uniform(
            keys[2 * i], (fan_in, fan_out), minval=-bound, maxval=bound,
            dtype=jnp.float32)
        params[f"b{i + 1}"] = jax.random.uniform(
            keys[2 * i + 1], (1, fan_out), minval=-bound, maxval=bound,
            dtype=jnp.float32)
    return params


if __name__ == "__main__":
    key = jax.random.PRNGKey(0)
    k_param, k_x = jax.random.split(key)

    INPUT_SHAPE = 256 * 3   # 768, as in MLP_classifier.__init__
    params = init_params(k_param, INPUT_SHAPE)
    act_dtype = _act_dtype()

    # Two cases: tiny batch (single tile) and a ragged batch that exercises the
    # multi-tile grid with a masked partial last block (1027 -> 2 tiles of 768).
    for B in (8, 1027):
        kx = jax.random.fold_in(k_x, B)
        x = jax.random.normal(kx, (B, INPUT_SHAPE), dtype=jnp.float32)

        out = jax.block_until_ready(mlp_classifier(x, params))
        ref = mlp_classifier_ref(x, params, act_dtype)

        assert out.shape == (B, 1), f"bad output shape {out.shape} (B={B})"
        assert jnp.allclose(out, ref, atol=5e-3, rtol=5e-3), \
            f"mismatch vs reference (B={B})"

        # sanity vs a full-f32 reference (bf16 streaming / bf16 tanh drift only)
        h = jnp.tanh(x @ params["w1"] + params["b1"])
        h = jnp.tanh(h @ params["w2"] + params["b2"])
        h = jnp.tanh(h @ params["w3"] + params["b3"])
        ref_f32 = jax.nn.sigmoid(h @ params["w4"] + params["b4"])
        assert jnp.allclose(out, ref_f32, atol=3e-2), f"bf16 drift too large (B={B})"

    print("KERNEL_OK")
</pallas_src>

<mosaic_0001>
module attributes {stable_mosaic.version = 11 : i64} {
  func.func @mlp_classifier_kernel(%arg0: i32, %arg1: memref<8x768xf32, #tpu.memory_space<vmem>>, %arg2: memref<768x256xbf16, #tpu.memory_space<vmem>>, %arg3: memref<1x256xf32, #tpu.memory_space<vmem>>, %arg4: memref<256x128xbf16, #tpu.memory_space<vmem>>, %arg5: memref<1x128xf32, #tpu.memory_space<vmem>>, %arg6: memref<128x64xbf16, #tpu.memory_space<vmem>>, %arg7: memref<1x64xf32, #tpu.memory_space<vmem>>, %arg8: memref<1x64xf32, #tpu.memory_space<vmem>>, %arg9: memref<1x1xf32, #tpu.memory_space<vmem>>, %arg10: memref<8x1xf32, #tpu.memory_space<vmem>>) attributes {dimension_semantics = [#tpu.dimension_semantics<parallel>], iteration_bounds = array<i64: 1>, scalar_prefetch = 0 : i64, scratch_operands = 0 : i64, tpu.core_type = #tpu.core_type<tc>, window_params = [{transform_indices = @transform_0, window_bounds = array<i64: 8, 768>}, {pipeline_mode = #tpu.pipeline_mode<synchronous>, transform_indices = @transform_1, window_bounds = array<i64: 768, 256>}, {pipeline_mode = #tpu.pipeline_mode<synchronous>, transform_indices = @transform_2, window_bounds = array<i64: 1, 256>}, {pipeline_mode = #tpu.pipeline_mode<synchronous>, transform_indices = @transform_3, window_bounds = array<i64: 256, 128>}, {pipeline_mode = #tpu.pipeline_mode<synchronous>, transform_indices = @transform_4, window_bounds = array<i64: 1, 128>}, {pipeline_mode = #tpu.pipeline_mode<synchronous>, transform_indices = @transform_5, window_bounds = array<i64: 128, 64>}, {pipeline_mode = #tpu.pipeline_mode<synchronous>, transform_indices = @transform_6, window_bounds = array<i64: 1, 64>}, {pipeline_mode = #tpu.pipeline_mode<synchronous>, transform_indices = @transform_7, window_bounds = array<i64: 1, 64>}, {pipeline_mode = #tpu.pipeline_mode<synchronous>, transform_indices = @transform_8, window_bounds = array<i64: 1, 1>}, {transform_indices = @transform_9, window_bounds = array<i64: 8, 1>}]} {
    %c0 = arith.constant 0 : index
    %c0_0 = arith.constant 0 : index
    %0 = vector.load %arg1[%c0, %c0_0] : memref<8x768xf32, #tpu.memory_space<vmem>>, vector<8x768xf32>
    %1 = arith.truncf %0 : vector<8x768xf32> to vector<8x768xbf16>
    %c0_1 = arith.constant 0 : index
    %c0_2 = arith.constant 0 : index
    %2 = vector.load %arg2[%c0_1, %c0_2] : memref<768x256xbf16, #tpu.memory_space<vmem>>, vector<768x256xbf16>
    %cst = arith.constant dense<0.000000e+00> : vector<8x256xf32>
    %3 = tpu.matmul %1, %2, %cst {dimension_numbers = #tpu.dot_dimension_numbers<[1], [0], [0], [1], [0, 0, 1, 1], [], []>} : vector<8x768xbf16>, vector<768x256xbf16>, vector<8x256xf32> -> vector<8x256xf32>
    %c0_3 = arith.constant 0 : index
    %c0_4 = arith.constant 0 : index
    %4 = vector.load %arg3[%c0_3, %c0_4] : memref<1x256xf32, #tpu.memory_space<vmem>>, vector<1x256xf32>
    %5 = vector.broadcast %4 : vector<1x256xf32> to vector<8x256xf32>
    %6 = arith.addf %3, %5 : vector<8x256xf32>
    %7 = math.tanh %6 : vector<8x256xf32>
    %8 = arith.truncf %7 : vector<8x256xf32> to vector<8x256xbf16>
    %c0_5 = arith.constant 0 : index
    %c0_6 = arith.constant 0 : index
    %9 = vector.load %arg4[%c0_5, %c0_6] : memref<256x128xbf16, #tpu.memory_space<vmem>>, vector<256x128xbf16>
    %cst_7 = arith.constant dense<0.000000e+00> : vector<8x128xf32>
    %10 = tpu.matmul %8, %9, %cst_7 {dimension_numbers = #tpu.dot_dimension_numbers<[1], [0], [0], [1], [0, 0, 1, 1], [], []>} : vector<8x256xbf16>, vector<256x128xbf16>, vector<8x128xf32> -> vector<8x128xf32>
    %c0_8 = arith.constant 0 : index
    %c0_9 = arith.constant 0 : index
    %11 = vector.load %arg5[%c0_8, %c0_9] : memref<1x128xf32, #tpu.memory_space<vmem>>, vector<1x128xf32>
    %12 = vector.broadcast %11 : vector<1x128xf32> to vector<8x128xf32>
    %13 = arith.addf %10, %12 : vector<8x128xf32>
    %14 = math.tanh %13 : vector<8x128xf32>
    %15 = arith.truncf %14 : vector<8x128xf32> to vector<8x128xbf16>
    %c0_10 = arith.constant 0 : index
    %c0_11 = arith.constant 0 : index
    %16 = vector.load %arg6[%c0_10, %c0_11] : memref<128x64xbf16, #tpu.memory_space<vmem>>, vector<128x64xbf16>
    %cst_12 = arith.constant dense<0.000000e+00> : vector<8x64xf32>
    %17 = tpu.matmul %15, %16, %cst_12 {dimension_numbers = #tpu.dot_dimension_numbers<[1], [0], [0], [1], [0, 0, 1, 1], [], []>} : vector<8x128xbf16>, vector<128x64xbf16>, vector<8x64xf32> -> vector<8x64xf32>
    %c0_13 = arith.constant 0 : index
    %c0_14 = arith.constant 0 : index
    %18 = vector.load %arg7[%c0_13, %c0_14] : memref<1x64xf32, #tpu.memory_space<vmem>>, vector<1x64xf32>
    %19 = vector.broadcast %18 : vector<1x64xf32> to vector<8x64xf32>
    %20 = arith.addf %17, %19 : vector<8x64xf32>
    %21 = math.tanh %20 : vector<8x64xf32>
    %c0_15 = arith.constant 0 : index
    %c0_16 = arith.constant 0 : index
    %22 = vector.load %arg8[%c0_15, %c0_16] : memref<1x64xf32, #tpu.memory_space<vmem>>, vector<1x64xf32>
    %23 = vector.broadcast %22 : vector<1x64xf32> to vector<8x64xf32>
    %24 = arith.mulf %21, %23 : vector<8x64xf32>
    %cst_17 = arith.constant dense<0.000000e+00> : vector<8xf32>
    %25 = vector.multi_reduction <add>, %24, %cst_17 [1] : vector<8x64xf32> to vector<8xf32>
    %26 = vector.shape_cast %25 : vector<8xf32> to vector<8x1xf32>
    %c0_18 = arith.constant 0 : index
    %c0_19 = arith.constant 0 : index
    %27 = vector.load %arg9[%c0_18, %c0_19] : memref<1x1xf32, #tpu.memory_space<vmem>>, vector<1x1xf32>
    %28 = vector.broadcast %27 : vector<1x1xf32> to vector<8x1xf32>
    %29 = arith.addf %26, %28 : vector<8x1xf32>
    %30 = arith.negf %29 : vector<8x1xf32>
    %31 = math.exp %30 : vector<8x1xf32>
    %cst_20 = arith.constant 1.000000e+00 : f32
    %32 = vector.broadcast %cst_20 : f32 to vector<8x1xf32>
    %33 = arith.addf %32, %31 : vector<8x1xf32>
    %34 = arith.divf %32, %33 : vector<8x1xf32>
    %c0_21 = arith.constant 0 : index
    %c0_22 = arith.constant 0 : index
    %35 = vector.load %arg10[%c0_21, %c0_22] : memref<8x1xf32, #tpu.memory_space<vmem>>, vector<8x1xf32>
    tpu.vector_store %arg10[%c0_21, %c0_22], %34 {strides = array<i32>} : memref<8x1xf32, #tpu.memory_space<vmem>>, vector<8x1xf32>,
    return
  }
  func.func @transform_0(%arg0: i32) -> (i32, i32) {
    %c0_i32 = arith.constant 0 : i32
    %c0_i32_0 = arith.constant 0 : i32
    return %arg0, %c0_i32 : i32, i32
  }
  func.func @transform_1(%arg0: i32) -> (i32, i32) {
    %c0_i32 = arith.constant 0 : i32
    %c0_i32_0 = arith.constant 0 : i32
    %c0_i32_1 = arith.constant 0 : i32
    return %c0_i32, %c0_i32_0 : i32, i32
  }
  func.func @transform_2(%arg0: i32) -> (i32, i32) {
    %c0_i32 = arith.constant 0 : i32
    %c0_i32_0 = arith.constant 0 : i32
    %c0_i32_1 = arith.constant 0 : i32
    return %c0_i32, %c0_i32_0 : i32, i32
  }
  func.func @transform_3(%arg0: i32) -> (i32, i32) {
    %c0_i32 = arith.constant 0 : i32
    %c0_i32_0 = arith.constant 0 : i32
    %c0_i32_1 = arith.constant 0 : i32
    return %c0_i32, %c0_i32_0 : i32, i32
  }
  func.func @transform_4(%arg0: i32) -> (i32, i32) {
    %c0_i32 = arith.constant 0 : i32
    %c0_i32_0 = arith.constant 0 : i32
    %c0_i32_1 = arith.constant 0 : i32
    return %c0_i32, %c0_i32_0 : i32, i32
  }
  func.func @transform_5(%arg0: i32) -> (i32, i32) {
    %c0_i32 = arith.constant 0 : i32
    %c0_i32_0 = arith.constant 0 : i32
    %c0_i32_1 = arith.constant 0 : i32
    return %c0_i32, %c0_i32_0 : i32, i32
  }
  func.func @transform_6(%arg0: i32) -> (i32, i32) {
    %c0_i32 = arith.constant 0 : i32
    %c0_i32_0 = arith.constant 0 : i32
    %c0_i32_1 = arith.constant 0 : i32
    return %c0_i32, %c0_i32_0 : i32, i32
  }
  func.func @transform_7(%arg0: i32) -> (i32, i32) {
    %c0_i32 = arith.constant 0 : i32
    %c0_i32_0 = arith.constant 0 : i32
    %c0_i32_1 = arith.constant 0 : i32
    return %c0_i32, %c0_i32_0 : i32, i32
  }
  func.func @transform_8(%arg0: i32) -> (i32, i32) {
    %c0_i32 = arith.constant 0 : i32
    %c0_i32_0 = arith.constant 0 : i32
    %c0_i32_1 = arith.constant 0 : i32
    return %c0_i32, %c0_i32_0 : i32, i32
  }
  func.func @transform_9(%arg0: i32) -> (i32, i32) {
    %c0_i32 = arith.constant 0 : i32
    %c0_i32_0 = arith.constant 0 : i32
    return %arg0, %c0_i32 : i32, i32
  }
}

</mosaic_0001>

<bundles_post_ra>
// kernel: tpu_custom_call.1
= control target key start
LH: loop header
LB: loop body
LE: loop exit
PB: predicated region body
PF: predicated region fallthrough
CT: control target
= control target key end

     0   :  { %s1675_s0 = inlined_call_operand.vmem [shape: f32[8,768], index: 0, kind: input, shape index: {}]   ;;  %s1676_s1 = inlined_call_operand.hbm [shape: bf16[768,256], index: 1, kind: input, shape index: {}]   ;;  %s1677_s2 = inlined_call_operand.vmem [shape: f32[1,256], index: 2, kind: input, shape index: {}]   ;;  %s1678_s3 = inlined_call_operand.hbm [shape: bf16[256,128], index: 3, kind: input, shape index: {}]   ;;  %s1679_s4 = inlined_call_operand.vmem [shape: f32[1,128], index: 4, kind: input, shape index: {}]   ;;  %s1680_s5 = inlined_call_operand.vmem [shape: bf16[128,64], index: 5, kind: input, shape index: {}]   ;;  %s1681_s6 = inlined_call_operand.vmem [shape: f32[1,64], index: 6, kind: input, shape index: {}]   ;;  %s1682_s7 = inlined_call_operand.vmem [shape: f32[1,64], index: 7, kind: input, shape index: {}]   ;;  %s1683_s8 = inlined_call_operand.<no memory space> [shape: f32[1,1], index: 8, kind: input, shape index: {}]   ;;  %s1684_s9 = inlined_call_operand.vmem [shape: f32[8,1], index: 9, kind: output, shape index: {}]  }
   0x1   :  { %v14_v0 = vstv %s1683_s8 }
   0x2   :  { %15 = vst [vmem:[#allocation2] sm:$0x1] %v14_v0 }
   0x3   :  { %16 = vsyncpa [#allocation4], 0 }
   0x4   :  { %17 = vsyncpa [#allocation6], 0  ;;  %s1533_s11 = smov [#allocation3]   ;;  %s1485_s15 = scalar_lea.hbm %s1676_s1, 12288 }
   0x5   :  { %s25_s12 = sshll.u32 %s1533_s11, 4  ;;  %p1486_p0 = scmp.ne.s32.totalorder %s1676_s1, %s1485_s15  ;;  %s26_s12 = int_to_ptr.vmem [resolvable:$true] %s25_s12 }
   0x6   :  { %p1489_p1 = scmp.lt.u32.totalorder %s1485_s15, %s1676_s1 }
   0x8   :  { %p1491_p2 = pnand %p1489_p1, %p1486_p0 }
   0xa   :  { %1494 = shalt.err (!%p1491_p2)
}
   0xb   :  { %s1495_s8 = scalar_lea.vmem %s26_s12, 12288  ;;  %p1500_p4 = scmp.lt.s32.totalorder %s26_s12, %s26_s12 }
   0xc   :  { %p1496_p3 = scmp.ne.s32.totalorder %s26_s12, %s1495_s8  ;;  %p1501_p5 = scmp.lt.s32.totalorder %s1495_s8, %s1495_s8 }
   0xe   :  { %p1502_p6 = por %p1501_p5, %p1500_p4 }
  0x10   :  { %p1503_p7 = pnand %p1502_p6, %p1496_p3 }
  0x12   :  { %1506 = shalt.err (!%p1503_p7)
}
  0x13   :  { %s1534_s20 = smov 128   ;;  %s1535_s21 = smov 8  }
  0x14   :  { %31 = dma.hbm_to_vmem [thread:$0]  %s1676_s1, 12288, %s26_s12, [#allocation4], %s1534_s20, %s1534_s20, %s1535_s21  }
  0x15   :  { %s1536_s24 = smov [#allocation5]   ;;  %s1507_s28 = scalar_lea.hbm %s1678_s3, 2048 }
  0x16   :  { %s39_s25 = sshll.u32 %s1536_s24, 4  ;;  %p1508_p8 = scmp.ne.s32.totalorder %s1678_s3, %s1507_s28  ;;  %s40_s25 = int_to_ptr.vmem [resolvable:$true] %s39_s25 }
  0x17   :  { %p1511_p9 = scmp.lt.u32.totalorder %s1507_s28, %s1678_s3 }
  0x19   :  { %p1513_p10 = pnand %p1511_p9, %p1508_p8 }
  0x1b   :  { %1516 = shalt.err (!%p1513_p10)
}
  0x1c   :  { %s1517_s13 = scalar_lea.vmem %s40_s25, 2048  ;;  %p1522_p12 = scmp.lt.s32.totalorder %s40_s25, %s40_s25 }
  0x1d   :  { %p1518_p11 = scmp.ne.s32.totalorder %s40_s25, %s1517_s13  ;;  %p1523_p13 = scmp.lt.s32.totalorder %s1517_s13, %s1517_s13 }
  0x1f   :  { %p1524_p0 = por %p1523_p13, %p1522_p12 }
  0x21   :  { %p1525_p1 = pnand %p1524_p0, %p1518_p11 }
  0x23   :  { %1528 = shalt.err (!%p1525_p1)
}
  0x24   :  { %s1537_s1 = smov 64   ;;  %s1538_s12 = smov 4  }
  0x25   :  { %45 = dma.hbm_to_vmem [thread:$0]  %s1678_s3, 2048, %s40_s25, [#allocation6], %s1537_s1, %s1537_s1, %s1538_s12  }
  0x26   :  { %1529 = dma.done.wait [#allocation4], 12288  }
  0x27   :  { %1530 = vsyncadd [#allocation4], 4294955008 }
  0x28   :  { %1531 = dma.done.wait [#allocation6], 2048  }
  0x29   :  { %1532 = vsyncadd [#allocation6], 4294965248  ;;  %v1305_v1 = vld [vmem:[#allocation3 + $0x104] ss:$8 sps:$4 sm:$0xff]   ;;  %v1307_v2 = vld [vmem:[#allocation3 + $0x100] ss:$8 sps:$4 sm:$0xff]  }
  0x2a   :  { %704 = vmatprep.subr.bf16.mxu0 %v1305_v1  ;;  %v1308_v3 = vld [vmem:[#allocation3 + $0x114] ss:$8 sps:$4 sm:$0xff]   ;;  %v1310_v4 = vld [vmem:[#allocation3 + $0x110] ss:$8 sps:$4 sm:$0xff]   ;;  %v1311_v5 = vld [vmem:[#allocation3 + $0x124] ss:$8 sps:$4 sm:$0xff]  }
  0x2b   :  { %705 = vmatpush1.bf16.msra.mxu0 %v1307_v2  ;;  %v1313_v6 = vld [vmem:[#allocation3 + $0x120] ss:$8 sps:$4 sm:$0xff]   ;;  %v1314_v7 = vld [vmem:[#allocation3 + $0x134] ss:$8 sps:$4 sm:$0xff]   ;;  %v1316_v8 = vld [vmem:[#allocation3 + $0x130] ss:$8 sps:$4 sm:$0xff]  }
  0x2c   :  { %706 = vmatprep.subr.bf16.mxu0 %v1308_v3  ;;  %v1317_v9 = vld [vmem:[#allocation3 + $0x144] ss:$8 sps:$4 sm:$0xff]   ;;  %v1319_v10 = vld [vmem:[#allocation3 + $0x140] ss:$8 sps:$4 sm:$0xff]   ;;  %v1320_v11 = vld [vmem:[#allocation3 + $0x154] ss:$8 sps:$4 sm:$0xff]  }
  0x2d   :  { %v1322_v12 = vld [vmem:[#allocation3 + $0x150] ss:$8 sps:$4 sm:$0xff]   ;;  %v1323_v13 = vld [vmem:[#allocation3 + $0x164] ss:$8 sps:$4 sm:$0xff]   ;;  %v1352_v15 = vld [vmem:[#allocation3] ss:$8 sps:$4 sm:$0xff]  }
  0x2e   :  { %v1350_v14 = vld [vmem:[#allocation3 + $0x4] ss:$8 sps:$4 sm:$0xff]   ;;  %v1325_v16 = vld [vmem:[#allocation3 + $0x160] ss:$8 sps:$4 sm:$0xff]   ;;  %v1326_v17 = vld [vmem:[#allocation3 + $0x174] ss:$8 sps:$4 sm:$0xff]  }
  0x2f   :  { %707 = vmatpush1.bf16.msra.mxu0 %v1310_v4  ;;  %663 = vmatprep.subr.bf16.mxu1 %v1350_v14  ;;  %v1356_v18 = vld [vmem:[#allocation3 + $0x14] ss:$8 sps:$4 sm:$0xff]   ;;  %v1358_v19 = vld [vmem:[#allocation3 + $0x10] ss:$8 sps:$4 sm:$0xff]   ;;  %v1362_v23 = vld [vmem:[#allocation3 + $0x24] ss:$8 sps:$4 sm:$0xff]  }
  0x30   :  { %708 = vmatprep.subr.bf16.mxu0 %v1311_v5  ;;  %664 = vmatpush1.bf16.msra.mxu1 %v1352_v15  ;;  %v66_v20 = vld [vmem:[%s1675_s0 + $0x18] sm:$0xff]  ;;  %v1364_v24 = vld [vmem:[#allocation3 + $0x20] ss:$8 sps:$4 sm:$0xff]   ;;  %v1329_v25 = vld [vmem:[#allocation3 + $0x184] ss:$8 sps:$4 sm:$0xff]   ;;  %vm1540_vm0 = vmmov 0  }
  0x31   :  { %v1328_v21 = vld [vmem:[#allocation3 + $0x170] ss:$8 sps:$4 sm:$0xff]   ;;  %665 = vmatprep.subr.bf16.mxu1 %v1356_v18  ;;  %v72_v22 = vpack.c.bf16 %v66_v20, %v66_v20  ;;  %v1368_v26 = vld [vmem:[#allocation3 + $0x34] ss:$8 sps:$4 sm:$0xff]   ;;  %v1331_v27 = vld [vmem:[#allocation3 + $0x180] ss:$8 sps:$4 sm:$0xff]  }
  0x32   :  { %v1370_v28 = vld [vmem:[#allocation3 + $0x30] ss:$8 sps:$4 sm:$0xff]   ;;  %v1332_v29 = vld [vmem:[#allocation3 + $0x194] ss:$8 sps:$4 sm:$0xff]   ;;  %v1374_v30 = vld [vmem:[#allocation3 + $0x44] ss:$8 sps:$4 sm:$0xff]  }
  0x33   :  { %709 = vmatpush1.bf16.msra.mxu0 %v1313_v6  ;;  %736 = vmatprep.mubr.bf16.mxu0 %v72_v22  ;;  %v1334_v31 = vld [vmem:[#allocation3 + $0x190] ss:$8 sps:$4 sm:$0xff]   ;;  %v1376_v32 = vld [vmem:[#allocation3 + $0x40] ss:$8 sps:$4 sm:$0xff]   ;;  %v1335_v33 = vld [vmem:[#allocation3 + $0x1a4] ss:$8 sps:$4 sm:$0xff]  }
  0x34   :  { %710 = vmatprep.subr.bf16.mxu0 %v1314_v7  ;;  %666 = vmatpush1.bf16.msra.mxu1 %v1358_v19  ;;  %v1380_v34 = vld [vmem:[#allocation3 + $0x54] ss:$8 sps:$4 sm:$0xff]   ;;  %v1337_v35 = vld [vmem:[#allocation3 + $0x1a0] ss:$8 sps:$4 sm:$0xff]   ;;  %v1382_v36 = vld [vmem:[#allocation3 + $0x50] ss:$8 sps:$4 sm:$0xff]  }
  0x35   :  { %667 = vmatprep.subr.bf16.mxu1 %v1362_v23  ;;  %v1338_v37 = vld [vmem:[#allocation3 + $0x1b4] ss:$8 sps:$4 sm:$0xff]   ;;  %v1386_v38 = vld [vmem:[#allocation3 + $0x64] ss:$8 sps:$4 sm:$0xff]   ;;  %v1340_v39 = vld [vmem:[#allocation3 + $0x1b0] ss:$8 sps:$4 sm:$0xff]  }
  0x36   :  { %v1388_v40 = vld [vmem:[#allocation3 + $0x60] ss:$8 sps:$4 sm:$0xff]   ;;  %v1341_v41 = vld [vmem:[#allocation3 + $0x1c4] ss:$8 sps:$4 sm:$0xff]   ;;  %v1392_v42 = vld [vmem:[#allocation3 + $0x74] ss:$8 sps:$4 sm:$0xff]  }
  0x37   :  { %711 = vmatpush1.bf16.msra.mxu0 %v1316_v8  ;;  %v1343_v43 = vld [vmem:[#allocation3 + $0x1c0] ss:$8 sps:$4 sm:$0xff]   ;;  %v1394_v44 = vld [vmem:[#allocation3 + $0x70] ss:$8 sps:$4 sm:$0xff]   ;;  %v1344_v45 = vld [vmem:[#allocation3 + $0x1d4] ss:$8 sps:$4 sm:$0xff]  }
  0x38   :  { %712 = vmatprep.subr.bf16.mxu0 %v1317_v9  ;;  %668 = vmatpush1.bf16.msra.mxu1 %v1364_v24  ;;  %v1398_v46 = vld [vmem:[#allocation3 + $0x84] ss:$8 sps:$4 sm:$0xff]   ;;  %v1346_v47 = vld [vmem:[#allocation3 + $0x1d0] ss:$8 sps:$4 sm:$0xff]   ;;  %v1400_v48 = vld [vmem:[#allocation3 + $0x80] ss:$8 sps:$4 sm:$0xff]  }
  0x39   :  { %669 = vmatprep.subr.bf16.mxu1 %v1368_v26  ;;  %v1347_v49 = vld [vmem:[#allocation3 + $0x1e4] ss:$8 sps:$4 sm:$0xff]   ;;  %v1404_v50 = vld [vmem:[#allocation3 + $0x94] ss:$8 sps:$4 sm:$0xff]   ;;  %v1349_v51 = vld [vmem:[#allocation3 + $0x1e0] ss:$8 sps:$4 sm:$0xff]  }
  0x3a   :  { %v1406_v52 = vld [vmem:[#allocation3 + $0x90] ss:$8 sps:$4 sm:$0xff]   ;;  %v1353_v53 = vld [vmem:[#allocation3 + $0x1f4] ss:$8 sps:$4 sm:$0xff]   ;;  %v1410_v54 = vld [vmem:[#allocation3 + $0xa4] ss:$8 sps:$4 sm:$0xff]  }
  0x3b   :  { %713 = vmatpush1.bf16.msra.mxu0 %v1319_v10  ;;  %v1355_v55 = vld [vmem:[#allocation3 + $0x1f0] ss:$8 sps:$4 sm:$0xff]   ;;  %v1412_v57 = vld [vmem:[#allocation3 + $0xa0] ss:$8 sps:$4 sm:$0xff]   ;;  %v1361_v58 = vld [vmem:[#allocation3 + $0x204] ss:$8 sps:$4 sm:$0xff]  }
  0x3c   :  { %714 = vmatprep.subr.bf16.mxu0 %v1320_v11  ;;  %670 = vmatpush1.bf16.msra.mxu1 %v1370_v28  ;;  %v65_v56 = vld [vmem:[%s1675_s0 + $0x10] sm:$0xff]  ;;  %v1359_v60 = vld [vmem:[#allocation3 + $0x200] ss:$8 sps:$4 sm:$0xff]   ;;  %vm1087_vm1 = vcmask 523264   ;;  %vm1105_vm2 = vcmask 7168  }
  0x3d   :  { %671 = vmatprep.subr.bf16.mxu1 %v1374_v30  ;;  %v1416_v59 = vld [vmem:[#allocation3 + $0xb4] ss:$8 sps:$4 sm:$0xff]   ;;  %v71_v61 = vpack.c.bf16 %v65_v56, %v65_v56  ;;  %v1418_v63 = vld [vmem:[#allocation3 + $0xb0] ss:$8 sps:$4 sm:$0xff]   ;;  %v64_v0 = vld [vmem:[%s1675_s0 + $0x8] sm:$0xff] }
  0x3e   :  { %v1367_v62 = vld [vmem:[#allocation3 + $0x214] ss:$8 sps:$4 sm:$0xff]   ;;  %v1422_v1 = vld [vmem:[#allocation3 + $0xc4] ss:$8 sps:$4 sm:$0xff]   ;;  %v70_v2 = vpack.c.bf16 %v64_v0, %v64_v0  ;;  %v1365_v3 = vld [vmem:[#allocation3 + $0x210] ss:$8 sps:$4 sm:$0xff]  }
  0x3f   :  { %715 = vmatpush1.bf16.msra.mxu0 %v1322_v12  ;;  %v68_v4 = vld [vmem:[%s1675_s0 + $0x28] sm:$0xff]  ;;  %v1428_v8 = vld [vmem:[#allocation3 + $0xd4] ss:$8 sps:$4 sm:$0xff]   ;;  %v1430_v11 = vld [vmem:[#allocation3 + $0xd0] ss:$8 sps:$4 sm:$0xff]  }
  0x40   :  { %716 = vmatprep.subr.bf16.mxu0 %v1323_v13  ;;  %672 = vmatpush1.bf16.msra.mxu1 %v1376_v32  ;;  %v1373_v5 = vld [vmem:[#allocation3 + $0x224] ss:$8 sps:$4 sm:$0xff]   ;;  %v74_v6 = vpack.c.bf16 %v68_v4, %v68_v4  ;;  %v1424_v7 = vld [vmem:[#allocation3 + $0xc0] ss:$8 sps:$4 sm:$0xff]   ;;  %v1379_v10 = vld [vmem:[#allocation3 + $0x234] ss:$8 sps:$4 sm:$0xff]  }
  0x41   :  { %673 = vmatprep.subr.bf16.mxu1 %v1380_v34  ;;  %695 = vmatprep.mubr.bf16.mxu1 %v70_v2  ;;  %v1371_v9 = vld [vmem:[#allocation3 + $0x220] ss:$8 sps:$4 sm:$0xff]   ;;  %v1434_v12 = vld [vmem:[#allocation3 + $0xe4] ss:$8 sps:$4 sm:$0xff]   ;;  %v1377_v13 = vld [vmem:[#allocation3 + $0x230] ss:$8 sps:$4 sm:$0xff]   ;;  %v173_v2 = vlaneseq }
  0x42   :  { %v1436_v14 = vld [vmem:[#allocation3 + $0xe0] ss:$8 sps:$4 sm:$0xff]   ;;  %v1385_v15 = vld [vmem:[#allocation3 + $0x244] ss:$8 sps:$4 sm:$0xff]   ;;  %v1442_v18 = vld [vmem:[#allocation3 + $0xf0] ss:$8 sps:$4 sm:$0xff]  }
  0x43   :  { %717 = vmatpush1.bf16.msra.mxu0 %v1325_v16  ;;  %v1440_v16 = vld [vmem:[#allocation3 + $0xf4] ss:$8 sps:$4 sm:$0xff]   ;;  %v1389_v22 = vld [vmem:[#allocation3 + $0x250] ss:$8 sps:$4 sm:$0xff]   ;;  %v1450_v23 = vld [vmem:[#allocation5] sm:$0xff]  }
  0x44   :  { %718 = vmatprep.subr.bf16.mxu0 %v1326_v17  ;;  %674 = vmatpush1.bf16.msra.mxu1 %v1382_v36  ;;  %v1383_v17 = vld [vmem:[#allocation3 + $0x240] ss:$8 sps:$4 sm:$0xff]   ;;  %v1391_v20 = vld [vmem:[#allocation3 + $0x254] ss:$8 sps:$4 sm:$0xff]   ;;  %v1409_v32 = vld [vmem:[#allocation3 + $0x284] ss:$8 sps:$4 sm:$0xff]  }
  0x45   :  { %675 = vmatprep.subr.bf16.mxu1 %v1386_v38  ;;  %v63_v19 = vld [vmem:[%s1675_s0] sm:$0xff]  ;;  %v1451_v26 = vld [vmem:[#allocation5 + $0x48] sm:$0xff]   ;;  %v1453_v30 = vld [vmem:[#allocation5 + $0x50] sm:$0xff]  }
  0x46   :  { %v69_v24 = vpack.c.bf16 %v63_v19, %v63_v19  ;;  %v1452_v28 = vld [vmem:[#allocation5 + $0x8] sm:$0xff]   ;;  %v1415_v34 = vld [vmem:[#allocation3 + $0x294] ss:$8 sps:$4 sm:$0xff]  }
  0x47   :  { %719 = vmatpush1.bf16.msra.mxu0 %v1328_v21  ;;  %v1449_v21 = vld [vmem:[#allocation5 + $0x40] sm:$0xff]   ;;  %v1427_v38 = vld [vmem:[#allocation3 + $0x2b4] ss:$8 sps:$4 sm:$0xff]   ;;  %v1460_v56 = vld [vmem:[#allocation5 + $0x28] sm:$0xff]  }
  0x48   :  { %720 = vmatprep.subr.bf16.mxu0 %v1329_v25  ;;  %676 = vmatpush1.bf16.msra.mxu1 %v1388_v40  ;;  %v1397_v25 = vld [vmem:[#allocation3 + $0x264] ss:$8 sps:$4 sm:$0xff]  }
  0x49   :  { %677 = vmatprep.subr.bf16.mxu1 %v1392_v42  ;;  %v1421_v36 = vld [vmem:[#allocation3 + $0x2a4] ss:$8 sps:$4 sm:$0xff]   ;;  %v1439_v42 = vld [vmem:[#allocation3 + $0x2d4] ss:$8 sps:$4 sm:$0xff]  }
  0x4a   :  { %v1433_v40 = vld [vmem:[#allocation3 + $0x2c4] ss:$8 sps:$4 sm:$0xff]  }
  0x4b   :  { %721 = vmatpush1.bf16.msra.mxu0 %v1331_v27  ;;  %v1395_v27 = vld [vmem:[#allocation3 + $0x260] ss:$8 sps:$4 sm:$0xff]  }
  0x4c   :  { %722 = vmatprep.subr.bf16.mxu0 %v1332_v29  ;;  %678 = vmatpush1.bf16.msra.mxu1 %v1394_v44  ;;  %v1403_v29 = vld [vmem:[#allocation3 + $0x274] ss:$8 sps:$4 sm:$0xff]   ;;  %v1445_v44 = vld [vmem:[#allocation3 + $0x2e4] ss:$8 sps:$4 sm:$0xff]  }
  0x4d   :  { %679 = vmatprep.subr.bf16.mxu1 %v1398_v46  ;;  %v1448_v46 = vld [vmem:[#allocation3 + $0x2f4] ss:$8 sps:$4 sm:$0xff]  }
  0x4f   :  { %723 = vmatpush1.bf16.msra.mxu0 %v1334_v31  ;;  %v1401_v31 = vld [vmem:[#allocation3 + $0x270] ss:$8 sps:$4 sm:$0xff]  }
  0x50   :  { %724 = vmatprep.subr.bf16.mxu0 %v1335_v33  ;;  %680 = vmatpush1.bf16.msra.mxu1 %v1400_v48  ;;  %v1407_v33 = vld [vmem:[#allocation3 + $0x280] ss:$8 sps:$4 sm:$0xff]  }
  0x51   :  { %681 = vmatprep.subr.bf16.mxu1 %v1404_v50  ;;  %v67_v48 = vld [vmem:[%s1675_s0 + $0x20] sm:$0xff]  ;;  %v1454_v50 = vld [vmem:[#allocation5 + $0x10] sm:$0xff]  }
  0x53   :  { %725 = vmatpush1.bf16.msra.mxu0 %v1337_v35  ;;  %v1413_v35 = vld [vmem:[#allocation3 + $0x290] ss:$8 sps:$4 sm:$0xff]  }
  0x54   :  { %726 = vmatprep.subr.bf16.mxu0 %v1338_v37  ;;  %682 = vmatpush1.bf16.msra.mxu1 %v1406_v52  ;;  %v1419_v37 = vld [vmem:[#allocation3 + $0x2a0] ss:$8 sps:$4 sm:$0xff]   ;;  %v1456_v52 = vld [vmem:[#allocation5 + $0x18] sm:$0xff]  }
  0x55   :  { %683 = vmatprep.subr.bf16.mxu1 %v1410_v54  ;;  %v1458_v54 = vld [vmem:[#allocation5 + $0x20] sm:$0xff]  }
  0x57   :  { %727 = vmatpush1.bf16.msra.mxu0 %v1340_v39  ;;  %v1425_v39 = vld [vmem:[#allocation3 + $0x2b0] ss:$8 sps:$4 sm:$0xff]  }
  0x58   :  { %728 = vmatprep.subr.bf16.mxu0 %v1341_v41  ;;  %684 = vmatpush1.bf16.msra.mxu1 %v1412_v57  ;;  %v1431_v41 = vld [vmem:[#allocation3 + $0x2c0] ss:$8 sps:$4 sm:$0xff]   ;;  %v1461_v57 = vld [vmem:[#allocation5 + $0x70] sm:$0xff]  }
  0x59   :  { %685 = vmatprep.subr.bf16.mxu1 %v1416_v59  ;;  %v1463_v59 = vld [vmem:[#allocation5 + $0x78] sm:$0xff]  }
  0x5b   :  { %729 = vmatpush1.bf16.msra.mxu0 %v1343_v43  ;;  %v1437_v43 = vld [vmem:[#allocation3 + $0x2d0] ss:$8 sps:$4 sm:$0xff]  }
  0x5c   :  { %730 = vmatprep.subr.bf16.mxu0 %v1344_v45  ;;  %686 = vmatpush1.bf16.msra.mxu1 %v1418_v63  ;;  %v1443_v45 = vld [vmem:[#allocation3 + $0x2e0] ss:$8 sps:$4 sm:$0xff]  }
  0x5d   :  { %687 = vmatprep.subr.bf16.mxu1 %v1422_v1 }
  0x5f   :  { %731 = vmatpush1.bf16.msra.mxu0 %v1346_v47  ;;  %v1446_v47 = vld [vmem:[#allocation3 + $0x2f0] ss:$8 sps:$4 sm:$0xff]  }
  0x60   :  { %732 = vmatprep.subr.bf16.mxu0 %v1347_v49  ;;  %688 = vmatpush1.bf16.msra.mxu1 %v1424_v7  ;;  %v73_v49 = vpack.c.bf16 %v67_v48, %v67_v48  ;;  %v1236_v48 = vld [vmem:[#allocation2] ss:$0 sm:$0xff] }
  0x61   :  { %689 = vmatprep.subr.bf16.mxu1 %v1428_v8 }
  0x63   :  { %733 = vmatpush1.bf16.msra.mxu0 %v1349_v51  ;;  %v1455_v51 = vld [vmem:[#allocation5 + $0x58] sm:$0xff]  }
  0x64   :  { %734 = vmatprep.subr.bf16.mxu0 %v1353_v53  ;;  %690 = vmatpush1.bf16.msra.mxu1 %v1430_v11  ;;  %v1457_v53 = vld [vmem:[#allocation5 + $0x60] sm:$0xff]  }
  0x65   :  { %691 = vmatprep.subr.bf16.mxu1 %v1434_v12 }
  0x67   :  { %735 = vmatpush1.bf16.msra.mxu0 %v1355_v55  ;;  %v1459_v55 = vld [vmem:[#allocation5 + $0x68] sm:$0xff]  }
  0x68   :  { %745 = vmatprep.subr.bf16.mxu0 %v1361_v58  ;;  %692 = vmatpush1.bf16.msra.mxu1 %v1436_v14  ;;  %v1462_v58 = vld [vmem:[#allocation5 + $0x30] sm:$0xff]  }
  0x69   :  { %693 = vmatprep.subr.bf16.mxu1 %v1440_v16 }
  0x6a   :  { %737 = vmatmul.mubr.bf16.vlgmr.msra.gmra.mrb[0].mxu0 %v71_v61  ;;  %v1539_v61 = vmov 0.0  }
  0x6b   :  { %746 = vmatpush1.bf16.msra.mxu0 %v1359_v60  ;;  %777 = vmatprep.mubr.bf16.mxu0 %v74_v6  ;;  %v1464_v60 = vld [vmem:[#allocation5 + $0x38] sm:$0xff]  }
  0x6c   :  { %747 = vmatprep.subr.bf16.mxu0 %v1367_v62  ;;  %694 = vmatpush1.bf16.msra.mxu1 %v1442_v18 }
  0x6d   :  { %1238 = vmatprep.subr.bf16.mxu1 %v1449_v21 }
  0x6f   :  { %748 = vmatpush1.bf16.msra.mxu0 %v1365_v3  ;;  %696 = vmatmul.mubr.bf16.vlgmr.msra.gmra.mrb[0].mxu1 %v69_v24  ;;  %v174_v3 = vshrl.u32 %v173_v2, 7  ;;  %v1468_v24 = vld [vmem:[%s1680_s5 + $0x18] sm:$0xff]  }
  0x70   :  { %749 = vmatprep.subr.bf16.mxu0 %v1373_v5  ;;  %1239 = vmatpush3.bf16.msra.mxu1 %v1450_v23  ;;  %v171_v5 = vld [vmem:[%s1677_s2] sm:$0x3]  ;;  %v1467_v23 = vld [vmem:[%s1680_s5 + $0x10] sm:$0xff]  }
  0x71   :  { %1240 = vmatprep.subr.bf16.mxu1 %v1451_v26  ;;  %v175_v4 = vsub.s32 0, %v174_v3  ;;  %v179_v6 = vsub.s32 1, %v174_v3  ;;  %v1470_v26 = vld [vmem:[%s1680_s5 + $0x28] sm:$0xff]  }
  0x73   :  { %750 = vmatpush1.bf16.msra.mxu0 %v1371_v9  ;;  %v176_v7 = vrot.slane %v171_v5, %v175_v4  ;;  %v180_v8 = vrot.slane %v171_v5, %v179_v6 }
  0x74   :  { %751 = vmatprep.subr.bf16.mxu0 %v1379_v10  ;;  %1241 = vmatpush3.bf16.msra.mxu1 %v1452_v28  ;;  %v1472_v28 = vld [vmem:[%s1680_s5 + $0x38] sm:$0xff]  }
  0x75   :  { %1242 = vmatprep.subr.bf16.mxu1 %v1453_v30  ;;  %v1209_v30 = vld [vmem:[%s1679_s4] ss:$0 sm:$0xff] }
  0x77   :  { %752 = vmatpush1.bf16.msra.mxu0 %v1377_v13 }
  0x78   :  { %753 = vmatprep.subr.bf16.mxu0 %v1385_v15  ;;  %1243 = vmatpush3.bf16.msra.mxu1 %v1454_v50 }
  0x79   :  { %1244 = vmatprep.subr.bf16.mxu1 %v1455_v51 }
  0x7b   :  { %754 = vmatpush1.bf16.msra.mxu0 %v1383_v17 }
  0x7c   :  { %755 = vmatprep.subr.bf16.mxu0 %v1391_v20  ;;  %1245 = vmatpush3.bf16.msra.mxu1 %v1456_v52  ;;  %v1465_v20 = vld [vmem:[%s1680_s5] sm:$0xff]  }
  0x7d   :  { %1246 = vmatprep.subr.bf16.mxu1 %v1457_v53 }
  0x7f   :  { %756 = vmatpush1.bf16.msra.mxu0 %v1389_v22  ;;  %v1466_v22 = vld [vmem:[%s1680_s5 + $0x8] sm:$0xff]  }
  0x80   :  { %757 = vmatprep.subr.bf16.mxu0 %v1397_v25  ;;  %1247 = vmatpush3.bf16.msra.mxu1 %v1458_v54  ;;  %v1469_v25 = vld [vmem:[%s1680_s5 + $0x20] sm:$0xff]  }
  0x81   :  { %1248 = vmatprep.subr.bf16.mxu1 %v1459_v55 }
  0x83   :  { %758 = vmatpush1.bf16.msra.mxu0 %v1395_v27  ;;  %v1471_v27 = vld [vmem:[%s1680_s5 + $0x30] sm:$0xff]  }
  0x84   :  { %759 = vmatprep.subr.bf16.mxu0 %v1403_v29  ;;  %1249 = vmatpush3.bf16.msra.mxu1 %v1460_v56 }
  0x85   :  { %1250 = vmatprep.subr.bf16.mxu1 %v1461_v57 }
  0x87   :  { %760 = vmatpush1.bf16.msra.mxu0 %v1401_v31 }
  0x88   :  { %761 = vmatprep.subr.bf16.mxu0 %v1409_v32  ;;  %1251 = vmatpush3.bf16.msra.mxu1 %v1462_v58 }
  0x89   :  { %1252 = vmatprep.subr.bf16.mxu1 %v1463_v59 }
  0x8b   :  { %762 = vmatpush1.bf16.msra.mxu0 %v1407_v33 }
  0x8c   :  { %763 = vmatprep.subr.bf16.mxu0 %v1415_v34  ;;  %1253 = vmatpush3.bf16.msra.mxu1 %v1464_v60 }
  0x8d   :  { %1269 = vmatprep.subr.bf16.mxu1 %v1539_v61 }
  0x8f   :  { %764 = vmatpush1.bf16.msra.mxu0 %v1413_v35 }
  0x90   :  { %765 = vmatprep.subr.bf16.mxu0 %v1421_v36 }
  0x93   :  { %766 = vmatpush1.bf16.msra.mxu0 %v1419_v37 }
  0x94   :  { %767 = vmatprep.subr.bf16.mxu0 %v1427_v38  ;;  %v1226_v38 = vld [vmem:[%s1681_s6] ss:$0 sm:$0xff] }
  0x97   :  { %768 = vmatpush1.bf16.msra.mxu0 %v1425_v39 }
  0x98   :  { %769 = vmatprep.subr.bf16.mxu0 %v1433_v40 }
  0x9b   :  { %770 = vmatpush1.bf16.msra.mxu0 %v1431_v41 }
  0x9c   :  { %771 = vmatprep.subr.bf16.mxu0 %v1439_v42 }
  0x9f   :  { %772 = vmatpush1.bf16.msra.mxu0 %v1437_v43 }
  0xa0   :  { %773 = vmatprep.subr.bf16.mxu0 %v1445_v44  ;;  %v1235_v44 = vld [vmem:[%s1682_s7] ss:$0 sm:$0xff] }
  0xa3   :  { %774 = vmatpush1.bf16.msra.mxu0 %v1443_v45 }
  0xa4   :  { %775 = vmatprep.subr.bf16.mxu0 %v1448_v46 }
  0xa7   :  { %776 = vmatpush1.bf16.msra.mxu0 %v1446_v47 }
  0xaa   :  { %778 = vmatmul.mubr.bf16.vlgmr.msra.gmra.mrb[0].mxu0 %v73_v49 }
 0x142   :  { %v697_v62 = vpop.f32.mrb[0].mxu1 }
 0x143   :  { %v699_v63 = vpop.f32.mrb[1].mxu1  ;;  %v698_v9 = vadd.f32 %v697_v62, %v176_v7 }
 0x144   :  { %v701_v0 = vpop.f32.mrb[2].mxu1  ;;  %v700_v10 = vadd.f32 %v699_v63, %v180_v8 }
 0x145   :  { %v702_v1 = vpop.f32.mrb[3].mxu1 }
 0x17d   :  { %v779_v11 = vpop.f32.mrb[0].mxu0 }
 0x17e   :  { %v1290_v12 = vadd.f32 %v779_v11, %v698_v9  ;;  %v781_v13 = vpop.f32.mrb[1].mxu0 }
 0x17f   :  { %v1292_v14 = vadd.f32 %v781_v13, %v700_v10  ;;  %v783_v15 = vpop.f32.mrb[2].mxu0 }
 0x180   :  { %1473 = vtanh.f32 %v1290_v12  ;;  %v784_v16 = vpop.f32.mrb[3].mxu0 }
 0x181   :  { %1475 = vtanh.f32 %v1292_v14 }
 0x18a   :  { %v1474_v17 = vpop.eup %1473 }
 0x18b   :  { %v1476_v18 = vpop.eup %1475  ;;  %v788_v21 = vpack.c.bf16 %v1474_v17, %v1474_v17 }
 0x18c   :  { %v789_v19 = vpack.c.bf16 %v1476_v18, %v1476_v18 }
 0x18e   :  { %957 = vmatprep.mubr.bf16.mxu1 %v789_v19 }
 0x18f   :  { %958 = vmatmul.mubr.bf16.vlgmr.msra.gmra.mrb[4].mxu1 %v788_v21 }
 0x190   :  { %1270 = vmatpush3.bf16.msra.mxu1 %v1465_v20  ;;  %1285 = vmatprep.mubr.msk.bf16.mxu1 %vm1540_vm0, %v1539_v61 }
 0x191   :  { %1271 = vmatprep.subr.bf16.mxu1 %v1539_v61 }
 0x194   :  { %1272 = vmatpush3.bf16.msra.mxu1 %v1466_v22 }
 0x195   :  { %1273 = vmatprep.subr.bf16.mxu1 %v1539_v61 }
 0x198   :  { %1274 = vmatpush3.bf16.msra.mxu1 %v1467_v23 }
 0x199   :  { %1275 = vmatprep.subr.bf16.mxu1 %v1539_v61 }
 0x19c   :  { %1276 = vmatpush3.bf16.msra.mxu1 %v1468_v24 }
 0x19d   :  { %1277 = vmatprep.subr.bf16.mxu1 %v1539_v61 }
 0x1a0   :  { %1278 = vmatpush3.bf16.msra.mxu1 %v1469_v25 }
 0x1a1   :  { %1279 = vmatprep.subr.bf16.mxu1 %v1539_v61 }
 0x1a4   :  { %1280 = vmatpush3.bf16.msra.mxu1 %v1470_v26 }
 0x1a5   :  { %1281 = vmatprep.subr.bf16.mxu1 %v1539_v61 }
 0x1a8   :  { %1282 = vmatpush3.bf16.msra.mxu1 %v1471_v27 }
 0x1a9   :  { %1283 = vmatprep.subr.bf16.mxu1 %v1539_v61 }
 0x1ac   :  { %1284 = vmatpush3.bf16.msra.mxu1 %v1472_v28 }
 0x262   :  { %v1254_v29 = vpop.f32.mrb[4].mxu1 }
 0x263   :  { %v1255_v31 = vpop.f32.mrb[5].mxu1 }
 0x264   :  { %v1256_v32 = vadd.f32 %v1255_v31, %v1254_v29  ;;  %v1257_v33 = vpop.f32.mrb[6].mxu1 }
 0x265   :  { %v1258_v34 = vpop.f32.mrb[7].mxu1 }
 0x266   :  { %v960_v35 = vadd.f32 %v1256_v32, %v1209_v30 }
 0x268   :  { %1477 = vtanh.f32 %v960_v35 }
 0x272   :  { %v1478_v36 = vpop.eup %1477 }
 0x273   :  { %v966_v37 = vpack.c.bf16 %v1478_v36, %v1478_v36 }
 0x275   :  { %1286 = vmatmul.mubr.bf16.vlgmr.msra.gmra.mrb[8].mxu1 %v966_v37 }
 0x348   :  { %v1072_v39 = vpop.f32.mrb[8].mxu1 }
 0x349   :  { %v1073_v40 = vadd.f32 %v1226_v38, %v1072_v39  ;;  %v1287_v41 = vpop.f32.mrb[9].mxu1 }
 0x34a   :  { %v1075_v42 = vpop.f32.mrb[10].mxu1 }
 0x34b   :  { %1479 = vtanh.f32 %v1073_v40  ;;  %v1288_v43 = vpop.f32.mrb[11].mxu1 }
 0x355   :  { %v1480_v45 = vpop.eup %1479 }
 0x356   :  { %v1086_v46 = vmul.f32 %v1480_v45, %v1235_v44 }
 0x358   :  { %v1088_v47 = vsel %vm1087_vm1, %v1086_v46, 0.0 }
 0x359   :  { %1089 = vadd.xlane.f32.xlu0 %v1088_v47 }
 0x3e6   :  { %v1090_v49 = vpop.xlane.xlu0 %1089 }
 0x3e7   :  { %v1098_v50 = vadd.f32 %v1236_v48, %v1090_v49 }
 0x3e9   :  { %v1237_v51 = vmul.f32 -1.442695, %v1098_v50 }
 0x3eb   :  { %1481 = vpow2.f32 %v1237_v51 }
 0x3f5   :  { %v1482_v52 = vpop.eup %1481 }
 0x3f6   :  { %v1102_v53 = vadd.f32 1.0, %v1482_v52 }
 0x3f8   :  { %1483 = vrcp.f32 %v1102_v53 }
 0x402   :  { %v1484_v54 = vpop.eup %1483 }
 0x403   :  { %1106 = vst.msk [vmem:[%s1684_s9] sm:$0xff] %vm1105_vm2, %v1484_v54 }
 0x404   :  { %1111 = vsyncpa [#allocation4], 1 }
 0x405   :  { %1112 = vsyncpa [#allocation6], 1 }

</bundles_post_ra>
